<compile_context>
chip_gen: v7x
topology: tpu7x:2x2x1
jax: 0.10.0
libtpu: 0.0.40
codegen_flags: <defaults>
</compile_context>

<pallas_src>
import functools

import jax
import jax.numpy as jnp
from jax.experimental import pallas as pl
from jax.experimental.pallas import tpu as pltpu

_LANES = 128


def _round_up(n, m):
    return ((n + m - 1) // m) * m


def _mlp_kernel(x_ref, w1_ref, b1_ref, w2_ref, b2_ref, w3_ref, b3_ref, o_ref):
    mxu_dtype = w1_ref.dtype  # f32 by default; bf16 if wrapper cast the weights
    x = x_ref[...].astype(mxu_dtype)
    # layer 1 + tanh (MXU accumulates in f32; bias add + tanh stay f32 on VPU/EUP)
    h = jnp.tanh(
        jnp.dot(x, w1_ref[...], preferred_element_type=jnp.float32) + b1_ref[...]
    )
    # layer 2 + tanh
    h = jnp.tanh(
        jnp.dot(h.astype(mxu_dtype), w2_ref[...], preferred_element_type=jnp.float32)
        + b2_ref[...]
    )
    # output layer (no activation); store is lane-dense (padded to 128 lanes)
    o_ref[...] = (
        jnp.dot(h.astype(mxu_dtype), w3_ref[...], preferred_element_type=jnp.float32)
        + b3_ref[...]
    ).astype(o_ref.dtype)


@functools.partial(jax.jit, static_argnames=("block_rows", "use_bf16"))
def feed_forward_nn_pallas(x, params, *, block_rows=512, use_bf16=False):
    """x: (B, n_in) f32.  params: dict of w1,b1,w2,b2,w3,b3 (weights stored (in, out))."""
    w1, b1 = params["w1"], params["b1"]
    w2, b2 = params["w2"], params["b2"]
    w3, b3 = params["w3"], params["b3"]

    n_in, n_h = w1.shape
    n_out = w3.shape[1]
    B = x.shape[0]

    hp = _round_up(n_h, _LANES)         # lane-aligned hidden width
    n_out_p = _round_up(n_out, _LANES)  # lane-dense output width

    w_dtype = jnp.bfloat16 if use_bf16 else jnp.float32

    # Zero-pad weights/biases to lane-aligned widths (exact: padded activations are
    # tanh(0)=0 and padded weight rows/cols are 0).
    w1p = jnp.pad(w1, ((0, 0), (0, hp - n_h))).astype(w_dtype)
    b1p = jnp.pad(b1.reshape(1, -1), ((0, 0), (0, hp - n_h))).astype(jnp.float32)
    w2p = jnp.pad(w2, ((0, hp - n_h), (0, hp - n_h))).astype(w_dtype)
    b2p = jnp.pad(b2.reshape(1, -1), ((0, 0), (0, hp - n_h))).astype(jnp.float32)
    w3p = jnp.pad(w3, ((0, hp - n_h), (0, n_out_p - n_out))).astype(w_dtype)
    b3p = jnp.pad(b3.reshape(1, -1), ((0, 0), (0, n_out_p - n_out))).astype(jnp.float32)

    # Batch tiling: TB rows per grid step (multiple of 8), pad B up to a whole grid.
    tb = _round_up(min(block_rows, max(B, 1)), 8)
    grid_b = pl.cdiv(B, tb)
    b_pad = grid_b * tb
    xp = jnp.pad(x.astype(jnp.float32), ((0, b_pad - B), (0, 0)))

    const = lambda shape: pl.BlockSpec(shape, lambda i: (0, 0))  # VMEM-resident

    out = pl.pallas_call(
        _mlp_kernel,
        out_shape=jax.ShapeDtypeStruct((b_pad, n_out_p), jnp.float32),
        grid=(grid_b,),
        in_specs=[
            pl.BlockSpec((tb, n_in), lambda i: (i, 0)),   # streamed X tile
            const((n_in, hp)), const((1, hp)),            # W1, b1 (resident)
            const((hp, hp)), const((1, hp)),              # W2, b2 (resident)
            const((hp, n_out_p)), const((1, n_out_p)),    # W3, b3 (resident)
        ],
        out_specs=pl.BlockSpec((tb, n_out_p), lambda i: (i, 0)),
        compiler_params=pltpu.CompilerParams(
            dimension_semantics=("parallel",),
        ),
    )(xp, w1p, b1p, w2p, b2p, w3p, b3p)

    return out[:B, :n_out]


def init_params(key, n_in=6, n_out=5, n_nodes=64):
    """Deterministic synthetic parameters.  Biases are zero (matching
    nn.init.constant_(m.bias, 0)); weights use nn.Linear's default uniform range."""
    k1, k2, k3 = jax.random.split(key, 3)

    def linear_w(k, fan_in, fan_out):
        bound = 1.0 / jnp.sqrt(fan_in)
        return jax.random.uniform(
            k, (fan_in, fan_out), minval=-bound, maxval=bound, dtype=jnp.float32
        )

    return {
        "w1": linear_w(k1, n_in, n_nodes),
        "b1": jnp.zeros((n_nodes,), jnp.float32),
        "w2": linear_w(k2, n_nodes, n_nodes),
        "b2": jnp.zeros((n_nodes,), jnp.float32),
        "w3": linear_w(k3, n_nodes, n_out),
        "b3": jnp.zeros((n_out,), jnp.float32),
    }


def _reference(x, p):
    h = jnp.tanh(x @ p["w1"] + p["b1"])
    h = jnp.tanh(h @ p["w2"] + p["b2"])
    return h @ p["w3"] + p["b3"]


if __name__ == "__main__":
    key = jax.random.PRNGKey(0)
    kx, kp = jax.random.split(key)

    n_in, n_out, n_nodes, batch = 6, 5, 64, 200  # non-multiple-of-8 batch on purpose
    x = jax.random.normal(kx, (batch, n_in), dtype=jnp.float32)
    params = init_params(kp, n_in=n_in, n_out=n_out, n_nodes=n_nodes)

    ref = _reference(x, params)

    # f32 MXU path (default) -- exercises the batch grid (block_rows=64 -> 4 steps).
    out = feed_forward_nn_pallas(x, params, block_rows=64)
    out = jax.block_until_ready(out)
    assert out.shape == (batch, n_out)
    assert jnp.allclose(out, ref, atol=2e-5, rtol=1e-5), "f32 kernel mismatch vs reference"

    # Single-tile path (default block_rows=512 covers the whole batch in one step).
    out_single = jax.block_until_ready(feed_forward_nn_pallas(x, params))
    assert jnp.allclose(out_single, ref, atol=2e-5, rtol=1e-5), "single-tile kernel mismatch"

    # Optional bf16 MXU path (v6e/v7x fast path); looser tolerance.
    out_bf16 = feed_forward_nn_pallas(x, params, block_rows=64, use_bf16=True)
    out_bf16 = jax.block_until_ready(out_bf16)
    assert jnp.allclose(out_bf16, ref, atol=1e-1, rtol=5e-2), "bf16 kernel mismatch vs reference"

    print("KERNEL_OK")
</pallas_src>

<mosaic_0001>
module attributes {stable_mosaic.version = 11 : i64} {
  func.func @_mlp_kernel(%arg0: i32, %arg1: memref<64x6xf32, #tpu.memory_space<vmem>>, %arg2: memref<6x128xf32, #tpu.memory_space<vmem>>, %arg3: memref<1x128xf32, #tpu.memory_space<vmem>>, %arg4: memref<128x128xf32, #tpu.memory_space<vmem>>, %arg5: memref<1x128xf32, #tpu.memory_space<vmem>>, %arg6: memref<128x128xf32, #tpu.memory_space<vmem>>, %arg7: memref<1x128xf32, #tpu.memory_space<vmem>>, %arg8: memref<64x128xf32, #tpu.memory_space<vmem>>) attributes {dimension_semantics = [#tpu.dimension_semantics<parallel>], iteration_bounds = array<i64: 4>, scalar_prefetch = 0 : i64, scratch_operands = 0 : i64, tpu.core_type = #tpu.core_type<tc>, window_params = [{transform_indices = @transform_0, window_bounds = array<i64: 64, 6>}, {pipeline_mode = #tpu.pipeline_mode<synchronous>, transform_indices = @transform_1, window_bounds = array<i64: 6, 128>}, {pipeline_mode = #tpu.pipeline_mode<synchronous>, transform_indices = @transform_2, window_bounds = array<i64: 1, 128>}, {pipeline_mode = #tpu.pipeline_mode<synchronous>, transform_indices = @transform_3, window_bounds = array<i64: 128, 128>}, {pipeline_mode = #tpu.pipeline_mode<synchronous>, transform_indices = @transform_4, window_bounds = array<i64: 1, 128>}, {pipeline_mode = #tpu.pipeline_mode<synchronous>, transform_indices = @transform_5, window_bounds = array<i64: 128, 128>}, {pipeline_mode = #tpu.pipeline_mode<synchronous>, transform_indices = @transform_6, window_bounds = array<i64: 1, 128>}, {transform_indices = @transform_7, window_bounds = array<i64: 64, 128>}]} {
    %c0 = arith.constant 0 : index
    %c0_0 = arith.constant 0 : index
    %0 = vector.load %arg1[%c0, %c0_0] : memref<64x6xf32, #tpu.memory_space<vmem>>, vector<64x6xf32>
    %c0_1 = arith.constant 0 : index
    %c0_2 = arith.constant 0 : index
    %1 = vector.load %arg2[%c0_1, %c0_2] : memref<6x128xf32, #tpu.memory_space<vmem>>, vector<6x128xf32>
    %cst = arith.constant dense<0.000000e+00> : vector<64x128xf32>
    %2 = tpu.matmul %0, %1, %cst {dimension_numbers = #tpu.dot_dimension_numbers<[1], [0], [0], [1], [0, 0, 1, 1], [], []>} : vector<64x6xf32>, vector<6x128xf32>, vector<64x128xf32> -> vector<64x128xf32>
    %c0_3 = arith.constant 0 : index
    %c0_4 = arith.constant 0 : index
    %3 = vector.load %arg3[%c0_3, %c0_4] : memref<1x128xf32, #tpu.memory_space<vmem>>, vector<1x128xf32>
    %4 = vector.broadcast %3 : vector<1x128xf32> to vector<64x128xf32>
    %5 = arith.addf %2, %4 : vector<64x128xf32>
    %6 = math.tanh %5 : vector<64x128xf32>
    %c0_5 = arith.constant 0 : index
    %c0_6 = arith.constant 0 : index
    %7 = vector.load %arg4[%c0_5, %c0_6] : memref<128x128xf32, #tpu.memory_space<vmem>>, vector<128x128xf32>
    %cst_7 = arith.constant dense<0.000000e+00> : vector<64x128xf32>
    %8 = tpu.matmul %6, %7, %cst_7 {dimension_numbers = #tpu.dot_dimension_numbers<[1], [0], [0], [1], [0, 0, 1, 1], [], []>} : vector<64x128xf32>, vector<128x128xf32>, vector<64x128xf32> -> vector<64x128xf32>
    %c0_8 = arith.constant 0 : index
    %c0_9 = arith.constant 0 : index
    %9 = vector.load %arg5[%c0_8, %c0_9] : memref<1x128xf32, #tpu.memory_space<vmem>>, vector<1x128xf32>
    %10 = vector.broadcast %9 : vector<1x128xf32> to vector<64x128xf32>
    %11 = arith.addf %8, %10 : vector<64x128xf32>
    %12 = math.tanh %11 : vector<64x128xf32>
    %c0_10 = arith.constant 0 : index
    %c0_11 = arith.constant 0 : index
    %13 = vector.load %arg6[%c0_10, %c0_11] : memref<128x128xf32, #tpu.memory_space<vmem>>, vector<128x128xf32>
    %cst_12 = arith.constant dense<0.000000e+00> : vector<64x128xf32>
    %14 = tpu.matmul %12, %13, %cst_12 {dimension_numbers = #tpu.dot_dimension_numbers<[1], [0], [0], [1], [0, 0, 1, 1], [], []>} : vector<64x128xf32>, vector<128x128xf32>, vector<64x128xf32> -> vector<64x128xf32>
    %c0_13 = arith.constant 0 : index
    %c0_14 = arith.constant 0 : index
    %15 = vector.load %arg7[%c0_13, %c0_14] : memref<1x128xf32, #tpu.memory_space<vmem>>, vector<1x128xf32>
    %16 = vector.broadcast %15 : vector<1x128xf32> to vector<64x128xf32>
    %17 = arith.addf %14, %16 : vector<64x128xf32>
    %c0_15 = arith.constant 0 : index
    %c0_16 = arith.constant 0 : index
    %18 = vector.load %arg8[%c0_15, %c0_16] : memref<64x128xf32, #tpu.memory_space<vmem>>, vector<64x128xf32>
    tpu.vector_store %arg8[%c0_15, %c0_16], %17 {strides = array<i32>} : memref<64x128xf32, #tpu.memory_space<vmem>>, vector<64x128xf32>,
    return
  }
  func.func @transform_0(%arg0: i32) -> (i32, i32) {
    %c0_i32 = arith.constant 0 : i32
    %c0_i32_0 = arith.constant 0 : i32
    return %arg0, %c0_i32 : i32, i32
  }
  func.func @transform_1(%arg0: i32) -> (i32, i32) {
    %c0_i32 = arith.constant 0 : i32
    %c0_i32_0 = arith.constant 0 : i32
    %c0_i32_1 = arith.constant 0 : i32
    return %c0_i32, %c0_i32_0 : i32, i32
  }
  func.func @transform_2(%arg0: i32) -> (i32, i32) {
    %c0_i32 = arith.constant 0 : i32
    %c0_i32_0 = arith.constant 0 : i32
    %c0_i32_1 = arith.constant 0 : i32
    return %c0_i32, %c0_i32_0 : i32, i32
  }
  func.func @transform_3(%arg0: i32) -> (i32, i32) {
    %c0_i32 = arith.constant 0 : i32
    %c0_i32_0 = arith.constant 0 : i32
    %c0_i32_1 = arith.constant 0 : i32
    return %c0_i32, %c0_i32_0 : i32, i32
  }
  func.func @transform_4(%arg0: i32) -> (i32, i32) {
    %c0_i32 = arith.constant 0 : i32
    %c0_i32_0 = arith.constant 0 : i32
    %c0_i32_1 = arith.constant 0 : i32
    return %c0_i32, %c0_i32_0 : i32, i32
  }
  func.func @transform_5(%arg0: i32) -> (i32, i32) {
    %c0_i32 = arith.constant 0 : i32
    %c0_i32_0 = arith.constant 0 : i32
    %c0_i32_1 = arith.constant 0 : i32
    return %c0_i32, %c0_i32_0 : i32, i32
  }
  func.func @transform_6(%arg0: i32) -> (i32, i32) {
    %c0_i32 = arith.constant 0 : i32
    %c0_i32_0 = arith.constant 0 : i32
    %c0_i32_1 = arith.constant 0 : i32
    return %c0_i32, %c0_i32_0 : i32, i32
  }
  func.func @transform_7(%arg0: i32) -> (i32, i32) {
    %c0_i32 = arith.constant 0 : i32
    %c0_i32_0 = arith.constant 0 : i32
    return %arg0, %c0_i32 : i32, i32
  }
}

</mosaic_0001>

<bundles_post_ra>
// kernel: feed_forward_nn_pallas.1
= control target key start
LH: loop header
LB: loop body
LE: loop exit
PB: predicated region body
PF: predicated region fallthrough
CT: control target
= control target key end

     0   :  { %s1102_s24 = smov 0   ;;  %s1242_s0 = inlined_call_operand.vmem [shape: f32[256,6], index: 0, kind: input, shape index: {}]   ;;  %s1243_s1 = inlined_call_operand.vmem [shape: f32[6,128], index: 1, kind: input, shape index: {}]   ;;  %s1244_s2 = inlined_call_operand.vmem [shape: f32[1,128], index: 2, kind: input, shape index: {}]   ;;  %s1245_s3 = inlined_call_operand.vmem [shape: f32[128,128], index: 3, kind: input, shape index: {}]   ;;  %s1246_s4 = inlined_call_operand.vmem [shape: f32[1,128], index: 4, kind: input, shape index: {}]   ;;  %s1247_s5 = inlined_call_operand.vmem [shape: f32[128,128], index: 5, kind: input, shape index: {}]   ;;  %s1248_s6 = inlined_call_operand.vmem [shape: f32[1,128], index: 6, kind: input, shape index: {}]   ;;  %s1249_s7 = inlined_call_operand.vmem [shape: f32[256,128], index: 7, kind: output, shape index: {}]  }
   0x1 LB: > { %s768_s25 = sadd.s32 4294967295, %s1060_s24   ;;  %p772_p0 = scmp.ge.s32.totalorder %s1060_s24, 1  ;;  %s1060_s24 = sphi %s1102_s24, %s17_s24  }
   0x2   : > { %p238_p1 = scmp.lt.s32.totalorder %s1060_s24, 5 }
   0x4   : > { %p239_p2 = pnand %p772_p0, %p238_p1 }
   0x5   : > { %v290_v0 = vld [vmem:[%s1243_s1] sm:$0x3f] (!%p239_p2)  ;;  %vm323_vm0 = vcmask (!%p239_p2), 1045504   ;;  %s773_s28 = sshll.u32 (!%p239_p2), %s768_s25, 3  ;;  %v441_v2 = vld [vmem:[%s1245_s3 + $0x8] sm:$0xff] (!%p239_p2)  ;;  %v442_v3 = vld [vmem:[%s1245_s3 + $0x10] sm:$0xff] (!%p239_p2) }
   0x6   : > { %242 = sbr.rel (%p239_p2) target bundleno = 700 (0x2bc), region = 48  ;;  %v440_v1 = vld [vmem:[%s1245_s3] sm:$0xff] (!%p239_p2)  ;;  %848 = vmatprep.subr.msk.mxu0 (!%p239_p2), %vm323_vm0, %v290_v0  ;;  %p271_p3 = scmp.lt.s32.totalorder (!%p239_p2), %s773_s28, 31  ;;  %v443_v4 = vld [vmem:[%s1245_s3 + $0x18] sm:$0xff] (!%p239_p2)  ;;  %v445_v8 = vld [vmem:[%s1245_s3 + $0x28] sm:$0xff] (!%p239_p2)  ;;  %vm298_vm1 = vcmask (!%p239_p2), 48128  }
   0x7   : > { %849 = vmatpush3.msk.msra.mxu0 (!%p239_p2), %vm323_vm0, %v290_v0  ;;  %v950_v5 = vpack.c.bf16 (!%p239_p2), %v441_v2, %v440_v1  ;;  %v954_v6 = vpack.c.bf16 (!%p239_p2), %v443_v4, %v442_v3  ;;  %v444_v7 = vld [vmem:[%s1245_s3 + $0x20] sm:$0xff] (!%p239_p2)  ;;  %v446_v10 = vld [vmem:[%s1245_s3 + $0x30] sm:$0xff] (!%p239_p2)  ;;  %v447_v11 = vld [vmem:[%s1245_s3 + $0x38] sm:$0xff] (!%p239_p2) }
   0x8   : > { %v958_v9 = vpack.c.bf16 (!%p239_p2), %v445_v8, %v444_v7  ;;  %v962_v16 = vpack.c.bf16 (!%p239_p2), %v447_v11, %v446_v10  ;;  %v448_v21 = vld [vmem:[%s1245_s3 + $0x40] sm:$0xff] (!%p239_p2)  ;;  %v449_v22 = vld [vmem:[%s1245_s3 + $0x48] sm:$0xff] (!%p239_p2)  ;;  %v450_v24 = vld [vmem:[%s1245_s3 + $0x50] sm:$0xff] (!%p239_p2) }
   0x9   : > { %951 = vmatprep.subr.bf16.mxu1 (!%p239_p2), %v950_v5  ;;  %v966_v23 = vpack.c.bf16 (!%p239_p2), %v449_v22, %v448_v21  ;;  %v451_v25 = vld [vmem:[%s1245_s3 + $0x58] sm:$0xff] (!%p239_p2)  ;;  %v452_v27 = vld [vmem:[%s1245_s3 + $0x60] sm:$0xff] (!%p239_p2)  ;;  %v453_v28 = vld [vmem:[%s1245_s3 + $0x68] sm:$0xff] (!%p239_p2) }
   0xa   : > { %953 = vmatpush3.bf16.msra.mxu1 (!%p239_p2), %v950_v5  ;;  %v970_v26 = vpack.c.bf16 (!%p239_p2), %v451_v25, %v450_v24  ;;  %v974_v29 = vpack.c.bf16 (!%p239_p2), %v453_v28, %v452_v27  ;;  %v454_v30 = vld [vmem:[%s1245_s3 + $0x70] sm:$0xff] (!%p239_p2)  ;;  %v455_v31 = vld [vmem:[%s1245_s3 + $0x78] sm:$0xff] (!%p239_p2)  ;;  %v576_v33 = vld [vmem:[%s1247_s5] sm:$0xff] (!%p239_p2) }
   0xb   : > { %955 = vmatprep.subr.bf16.mxu1 (!%p239_p2), %v954_v6  ;;  %v978_v32 = vpack.c.bf16 (!%p239_p2), %v455_v31, %v454_v30  ;;  %v577_v34 = vld [vmem:[%s1247_s5 + $0x8] sm:$0xff] (!%p239_p2)  ;;  %v578_v35 = vld [vmem:[%s1247_s5 + $0x10] sm:$0xff] (!%p239_p2)  ;;  %v579_v37 = vld [vmem:[%s1247_s5 + $0x18] sm:$0xff] (!%p239_p2) }
   0xc   : > { %v982_v36 = vpack.c.bf16 (!%p239_p2), %v577_v34, %v576_v33  ;;  %v986_v38 = vpack.c.bf16 (!%p239_p2), %v579_v37, %v578_v35  ;;  %v580_v39 = vld [vmem:[%s1247_s5 + $0x20] sm:$0xff] (!%p239_p2)  ;;  %v581_v40 = vld [vmem:[%s1247_s5 + $0x28] sm:$0xff] (!%p239_p2)  ;;  %v582_v42 = vld [vmem:[%s1247_s5 + $0x30] sm:$0xff] (!%p239_p2) }
   0xd   : > { %s1251_s28 = smov (!%p271_p3, %s773_s28), 31  ;;  %v990_v41 = vpack.c.bf16 %v581_v40, %v580_v39  ;;  %v583_v43 = vld [vmem:[%s1247_s5 + $0x38] sm:$0xff]  ;;  %v777_v45 = vld [vmem:[%s1244_s2] ss:$0 sm:$0xff]  ;;  %v585_v7 = vld [vmem:[%s1247_s5 + $0x48] sm:$0xff] }
   0xe   : > { %s774_s18 = sshll.u32 %s1251_s28, 3  ;;  %957 = vmatpush3.bf16.msra.mxu1 %v954_v6  ;;  %983 = vmatprep.subr.bf16.mxu0 %v982_v36  ;;  %v994_v44 = vpack.c.bf16 %v583_v43, %v582_v42  ;;  %v584_v6 = vld [vmem:[%s1247_s5 + $0x40] sm:$0xff]  ;;  %v587_v10 = vld [vmem:[%s1247_s5 + $0x58] sm:$0xff] }
   0xf   : > { %s274_s21 = scalar_lea.vmem %s1242_s0, %s774_s18  ;;  %959 = vmatprep.subr.bf16.mxu1 %v958_v9  ;;  %v998_v8 = vpack.c.bf16 %v585_v7, %v584_v6  ;;  %v788_v43 = vld [vmem:[%s1248_s6] ss:$0 sm:$0xff]  ;;  %s280_s22 = scalar_lea.vmem %s1249_s7, %s774_s18 }
  0x10   : > { %v282_v12 = vld [vmem:[%s274_s21] sm:$0xff]  ;;  %v283_v13 = vld [vmem:[%s274_s21 + $0x8] sm:$0xff]  ;;  %v284_v14 = vld [vmem:[%s274_s21 + $0x10] sm:$0xff] }
  0x11   : > { %850 = vmatprep.mubr.msk.f32.mxu0 %vm298_vm1, %v282_v12  ;;  %v285_v15 = vld [vmem:[%s274_s21 + $0x18] sm:$0xff]  ;;  %v286_v17 = vld [vmem:[%s274_s21 + $0x20] sm:$0xff]  ;;  %v287_v18 = vld [vmem:[%s274_s21 + $0x28] sm:$0xff] }
  0x12   : > { %851 = vmatmul.mubr.msk.f32.vlgmr.msra.gmra.mrb[0].mxu0 %vm298_vm1, %v283_v13  ;;  %961 = vmatpush3.bf16.msra.mxu1 %v958_v9  ;;  %v288_v19 = vld [vmem:[%s274_s21 + $0x30] sm:$0xff]  ;;  %v289_v20 = vld [vmem:[%s274_s21 + $0x38] sm:$0xff]  ;;  %v588_v12 = vld [vmem:[%s1247_s5 + $0x60] sm:$0xff] }
  0x13   : > { %853 = vmatprep.mubr.msk.f32.mxu0 %vm298_vm1, %v284_v14  ;;  %963 = vmatprep.subr.bf16.mxu1 %v962_v16  ;;  %v586_v9 = vld [vmem:[%s1247_s5 + $0x50] sm:$0xff]  ;;  %v589_v13 = vld [vmem:[%s1247_s5 + $0x68] sm:$0xff] }
  0x14   : > { %985 = vmatpush3.bf16.msra.mxu0 %v982_v36  ;;  %v1002_v11 = vpack.c.bf16 %v587_v10, %v586_v9  ;;  %v1006_v14 = vpack.c.bf16 %v589_v13, %v588_v12 }
  0x15   : > { %987 = vmatprep.subr.bf16.mxu0 %v986_v38 }
  0x16   : > { %854 = vmatmul.mubr.msk.f32.gmra.mrb[2].mxu0 %vm298_vm1, %v285_v15  ;;  %965 = vmatpush3.bf16.msra.mxu1 %v962_v16  ;;  %v590_v15 = vld [vmem:[%s1247_s5 + $0x70] sm:$0xff]  ;;  %v591_v16 = vld [vmem:[%s1247_s5 + $0x78] sm:$0xff] }
  0x17   : > { %856 = vmatprep.mubr.msk.f32.mxu0 %vm298_vm1, %v286_v17  ;;  %967 = vmatprep.subr.bf16.mxu1 %v966_v23  ;;  %v1010_v17 = vpack.c.bf16 %v591_v16, %v590_v15 }
  0x18   : > { %989 = vmatpush3.bf16.msra.mxu0 %v986_v38 }
  0x19   : > { %991 = vmatprep.subr.bf16.mxu0 %v990_v41 }
  0x1a   : > { %857 = vmatmul.mubr.msk.f32.gmra.mrb[4].mxu0 %vm298_vm1, %v287_v18  ;;  %969 = vmatpush3.bf16.msra.mxu1 %v966_v23  ;;  %v787_v18 = vld [vmem:[%s1246_s4] ss:$0 sm:$0xff] }
  0x1b   : > { %859 = vmatprep.mubr.msk.f32.mxu0 %vm298_vm1, %v288_v19  ;;  %971 = vmatprep.subr.bf16.mxu1 %v970_v26 }
  0x1c   : > { %993 = vmatpush3.bf16.msra.mxu0 %v990_v41 }
  0x1d   : > { %995 = vmatprep.subr.bf16.mxu0 %v994_v44 }
  0x1e   : > { %860 = vmatmul.mubr.msk.f32.gmra.mrb[6].mxu0 %vm298_vm1, %v289_v20  ;;  %973 = vmatpush3.bf16.msra.mxu1 %v970_v26 }
  0x1f   : > { %975 = vmatprep.subr.bf16.mxu1 %v974_v29 }
  0x20   : > { %997 = vmatpush3.bf16.msra.mxu0 %v994_v44 }
  0x21   : > { %999 = vmatprep.subr.bf16.mxu0 %v998_v8 }
  0x22   : > { %977 = vmatpush3.bf16.msra.mxu1 %v974_v29 }
  0x23   : > { %979 = vmatprep.subr.bf16.mxu1 %v978_v32 }
  0x24   : > { %1001 = vmatpush3.bf16.msra.mxu0 %v998_v8 }
  0x25   : > { %1003 = vmatprep.subr.bf16.mxu0 %v1002_v11 }
  0x26   : > { %981 = vmatpush3.bf16.msra.mxu1 %v978_v32 }
  0x28   : > { %1005 = vmatpush3.bf16.msra.mxu0 %v1002_v11 }
  0x29   : > { %1007 = vmatprep.subr.bf16.mxu0 %v1006_v14 }
  0x2c   : > { %1009 = vmatpush3.bf16.msra.mxu0 %v1006_v14 }
  0x2d   : > { %1011 = vmatprep.subr.bf16.mxu0 %v1010_v17 }
  0x30   : > { %1013 = vmatpush3.bf16.msra.mxu0 %v1010_v17 }
  0xe5   : > { %v852_v46 = vpop.f32.mrb[0].mxu0 }
  0xe6   : > { %v399_v47 = vadd.f32 %v852_v46, %v777_v45  ;;  %v393_v48 = vpop.f32.mrb[1].mxu0 }
  0xe7   : > { %v394_v49 = vadd.f32 %v777_v45, %v393_v48 }
  0xe9   : > { %1022 = vtanh.f32 %v394_v49  ;;  %v855_v50 = vpop.f32.mrb[2].mxu0 }
  0xea   : > { %1024 = vtanh.f32 %v399_v47  ;;  %v409_v51 = vadd.f32 %v855_v50, %v777_v45  ;;  %v403_v52 = vpop.f32.mrb[3].mxu0 }
  0xeb   : > { %v404_v53 = vadd.f32 %v777_v45, %v403_v52 }
  0xed   : > { %1026 = vtanh.f32 %v404_v53  ;;  %v858_v54 = vpop.f32.mrb[4].mxu0 }
  0xee   : > { %1028 = vtanh.f32 %v409_v51  ;;  %v419_v55 = vadd.f32 %v858_v54, %v777_v45  ;;  %v413_v56 = vpop.f32.mrb[5].mxu0 }
  0xef   : > { %v414_v57 = vadd.f32 %v777_v45, %v413_v56 }
  0xf1   : > { %1030 = vtanh.f32 %v414_v57  ;;  %v861_v58 = vpop.f32.mrb[6].mxu0 }
  0xf2   : > { %1032 = vtanh.f32 %v419_v55  ;;  %v429_v59 = vadd.f32 %v861_v58, %v777_v45  ;;  %v423_v60 = vpop.f32.mrb[7].mxu0 }
  0xf3   : > { %v1023_v61 = vpop.eup %1022  ;;  %v424_v62 = vadd.f32 %v777_v45, %v423_v60 }
  0xf4   : > { %v1025_v63 = vpop.eup %1024  ;;  %894 = vmatprep.mubr.f32.mxu1 %v1023_v61 }
  0xf5   : > { %1034 = vtanh.f32 %v424_v62  ;;  %895 = vmatmul.mubr.f32.vlgmr.msra.gmra.mrb[0].mxu1 %v1025_v63 }
  0xf6   : > { %1036 = vtanh.f32 %v429_v59 }
  0xf7   : > { %v1027_v0 = vpop.eup %1026 }
  0xf8   : > { %v1029_v1 = vpop.eup %1028  ;;  %897 = vmatprep.mubr.f32.mxu1 %v1027_v0 }
  0xf9   : > { %898 = vmatmul.mubr.f32.gmra.mrb[2].mxu1 %v1029_v1 }
  0xfb   : > { %v1031_v2 = vpop.eup %1030 }
  0xfc   : > { %v1033_v3 = vpop.eup %1032  ;;  %900 = vmatprep.mubr.f32.mxu1 %v1031_v2 }
  0xfd   : > { %901 = vmatmul.mubr.f32.gmra.mrb[4].mxu1 %v1033_v3 }
  0xff   : > { %v1035_v4 = vpop.eup %1034 }
 0x100   : > { %v1037_v5 = vpop.eup %1036  ;;  %903 = vmatprep.mubr.f32.mxu1 %v1035_v4 }
 0x101   : > { %904 = vmatmul.mubr.f32.gmra.mrb[6].mxu1 %v1037_v5 }
 0x1c8   : > { %v896_v19 = vpop.f32.mrb[0].mxu1 }
 0x1c9   : > { %v535_v20 = vadd.f32 %v896_v19, %v787_v18  ;;  %v529_v21 = vpop.f32.mrb[1].mxu1 }
 0x1ca   : > { %v530_v22 = vadd.f32 %v787_v18, %v529_v21 }
 0x1cc   : > { %1038 = vtanh.f32 %v530_v22  ;;  %v899_v23 = vpop.f32.mrb[2].mxu1 }
 0x1cd   : > { %1040 = vtanh.f32 %v535_v20  ;;  %v545_v24 = vadd.f32 %v899_v23, %v787_v18  ;;  %v539_v25 = vpop.f32.mrb[3].mxu1 }
 0x1ce   : > { %v540_v26 = vadd.f32 %v787_v18, %v539_v25 }
 0x1d0   : > { %1042 = vtanh.f32 %v540_v26  ;;  %v902_v27 = vpop.f32.mrb[4].mxu1 }
 0x1d1   : > { %1044 = vtanh.f32 %v545_v24  ;;  %v555_v28 = vadd.f32 %v902_v27, %v787_v18  ;;  %v549_v29 = vpop.f32.mrb[5].mxu1 }
 0x1d2   : > { %v550_v30 = vadd.f32 %v787_v18, %v549_v29 }
 0x1d4   : > { %1046 = vtanh.f32 %v550_v30  ;;  %v905_v31 = vpop.f32.mrb[6].mxu1 }
 0x1d5   : > { %1048 = vtanh.f32 %v555_v28  ;;  %v565_v32 = vadd.f32 %v905_v31, %v787_v18  ;;  %v559_v33 = vpop.f32.mrb[7].mxu1 }
 0x1d6   : > { %v1039_v34 = vpop.eup %1038  ;;  %v560_v35 = vadd.f32 %v787_v18, %v559_v33 }
 0x1d7   : > { %v1041_v36 = vpop.eup %1040  ;;  %938 = vmatprep.mubr.f32.mxu0 %v1039_v34 }
 0x1d8   : > { %1050 = vtanh.f32 %v560_v35  ;;  %939 = vmatmul.mubr.f32.vlgmr.msra.gmra.mrb[8].mxu0 %v1041_v36 }
 0x1d9   : > { %1052 = vtanh.f32 %v565_v32 }
 0x1da   : > { %v1043_v37 = vpop.eup %1042 }
 0x1db   : > { %v1045_v38 = vpop.eup %1044  ;;  %941 = vmatprep.mubr.f32.mxu0 %v1043_v37 }
 0x1dc   : > { %942 = vmatmul.mubr.f32.gmra.mrb[10].mxu0 %v1045_v38 }
 0x1de   : > { %v1047_v39 = vpop.eup %1046 }
 0x1df   : > { %v1049_v40 = vpop.eup %1048  ;;  %944 = vmatprep.mubr.f32.mxu0 %v1047_v39 }
 0x1e0   : > { %945 = vmatmul.mubr.f32.gmra.mrb[12].mxu0 %v1049_v40 }
 0x1e2   : > { %v1051_v41 = vpop.eup %1050 }
 0x1e3   : > { %v1053_v42 = vpop.eup %1052  ;;  %947 = vmatprep.mubr.f32.mxu0 %v1051_v41 }
 0x1e4   : > { %948 = vmatmul.mubr.f32.gmra.mrb[14].mxu0 %v1053_v42 }
 0x2ab   : > { %v940_v44 = vpop.f32.mrb[8].mxu0 }
 0x2ac   : > { %v671_v45 = vadd.f32 %v940_v44, %v788_v43  ;;  %v665_v46 = vpop.f32.mrb[9].mxu0 }
 0x2ad   : > { %v666_v47 = vadd.f32 %v788_v43, %v665_v46 }
 0x2ae   : > { %705 = vst [vmem:[%s280_s22 + $0x8] sm:$0xff] %v671_v45 }
 0x2af   : > { %704 = vst [vmem:[%s280_s22] sm:$0xff] %v666_v47  ;;  %v943_v48 = vpop.f32.mrb[10].mxu0 }
 0x2b0   : > { %v681_v49 = vadd.f32 %v943_v48, %v788_v43  ;;  %v675_v50 = vpop.f32.mrb[11].mxu0 }
 0x2b1   : > { %v676_v51 = vadd.f32 %v788_v43, %v675_v50 }
 0x2b2   : > { %707 = vst [vmem:[%s280_s22 + $0x18] sm:$0xff] %v681_v49 }
 0x2b3   : > { %706 = vst [vmem:[%s280_s22 + $0x10] sm:$0xff] %v676_v51  ;;  %v946_v52 = vpop.f32.mrb[12].mxu0 }
 0x2b4   : > { %v691_v53 = vadd.f32 %v946_v52, %v788_v43  ;;  %v685_v54 = vpop.f32.mrb[13].mxu0 }
 0x2b5   : > { %v686_v55 = vadd.f32 %v788_v43, %v685_v54 }
 0x2b6   : > { %709 = vst [vmem:[%s280_s22 + $0x28] sm:$0xff] %v691_v53 }
 0x2b7   : > { %708 = vst [vmem:[%s280_s22 + $0x20] sm:$0xff] %v686_v55  ;;  %v949_v56 = vpop.f32.mrb[14].mxu0 }
 0x2b8   : > { %v701_v57 = vadd.f32 %v949_v56, %v788_v43  ;;  %v695_v58 = vpop.f32.mrb[15].mxu0 }
 0x2b9   : > { %v696_v59 = vadd.f32 %v788_v43, %v695_v58 }
 0x2ba   : > { %711 = vst [vmem:[%s280_s22 + $0x38] sm:$0xff] %v701_v57 }
 0x2bb   : > { %710 = vst [vmem:[%s280_s22 + $0x30] sm:$0xff] %v696_v59 }
 0x2bc PF: > { %s17_s24 = sadd.s32 1, %s1060_s24  }
 0x2bd   : > { %p14_p4 = scmp.ge.s32.totalorder %s17_s24, 6  }
 0x2bf   :  { %16 = sbr.rel (!%p14_p4) target bundleno = 1 (0x1), region = 78 }

</bundles_post_ra>
